<compile_context>
chip_gen: v6e
topology: v6e:2x2x1
jax: 0.10.0
libtpu: 0.0.40
codegen_flags: <defaults>
</compile_context>

<pallas_src>
import functools

import jax
import jax.numpy as jnp
from jax import lax
from jax.experimental import pallas as pl
from jax.experimental.pallas import tpu as pltpu

_MIB = 1024 * 1024
# Below this total footprint the ~0.35us/step grid overhead dominates; run a
# single-step kernel with the whole problem in VMEM.
_SMALL_PROBLEM_BYTES = 2 * _MIB

# Flipped to False (once) if this jax build rejects BlockSpec pipeline_mode.
_PIPELINE_MODE_OK = True


def _round_up(x, m):
    return ((x + m - 1) // m) * m


def _round_down_to(x, m):
    return max(m, (x // m) * m)


@functools.lru_cache(maxsize=None)
def _vmem_budget_and_limit():
    """Generation-aware VMEM budgets (v5e/v6e: 128 MiB, v7x: 64 MiB)."""
    cap = 64 * _MIB  # conservative fallback = smallest physical VMEM (v7x)
    try:
        cap = int(pltpu.get_tpu_info().vmem_capacity_bytes)
    except Exception:
        pass
    budget = int(cap * 0.68)  # working-set used for tile selection
    limit = int(cap * 0.82)   # scoped-vmem limit handed to Mosaic
    return budget, limit


def _cost_estimate(adj, embeds, out_dtype):
    M, K = adj.shape
    _, D = embeds.shape
    return pl.CostEstimate(
        flops=2 * M * K * D,
        transcendentals=0,
        bytes_accessed=(M * K * adj.dtype.itemsize
                        + K * D * embeds.dtype.itemsize
                        + M * D * jnp.dtype(out_dtype).itemsize),
    )


# ----------------------------------------------------------------------------
# Kernels
# ----------------------------------------------------------------------------
def _mask_k_tail(a, k, tk, k_total):
    # Zero the adj columns that lie beyond K (only the last k step has any).
    # Edge blocks are not padded in HBM, so their out-of-bounds VMEM contents
    # are garbage (possibly NaN) and must not reach the MXU reduction.
    valid = k_total - k * tk
    col = lax.broadcasted_iota(jnp.int32, a.shape, 1)
    return jnp.where(col < valid, a, 0)


def _gcn_small_kernel(adj_ref, emb_ref, out_ref, *, precision):
    # Whole problem resident in VMEM: one MXU pass, no grid bookkeeping.
    out_ref[...] = jnp.dot(
        adj_ref[...], emb_ref[...],
        preferred_element_type=jnp.float32, precision=precision,
    ).astype(out_ref.dtype)


def _gcn_resident_accout_kernel(adj_ref, emb_ref, out_ref, *, tk, k_total,
                                mask_k, precision):
    # embeds panel (kp, dp) resident in VMEM (read from HBM exactly once);
    # adj streams (tm, tk) tiles.  Output dtype is f32, so accumulate directly
    # into the output block (resident across k): no scratch, no final copy.
    k = pl.program_id(1)

    @pl.when(k == 0)
    def _():
        out_ref[...] = jnp.zeros_like(out_ref)

    a = adj_ref[...]
    if mask_k:
        a = _mask_k_tail(a, k, tk, k_total)
    koff = pl.multiple_of(k * tk, tk)
    out_ref[...] += jnp.dot(
        a, emb_ref[pl.ds(koff, tk), :],
        preferred_element_type=jnp.float32, precision=precision)


def _gcn_resident_scratch_kernel(adj_ref, emb_ref, out_ref, acc_ref, *, tk,
                                 k_total, mask_k, precision):
    # Same as above but for narrow output dtypes: f32 scratch accumulator,
    # cast on the last reduction step.
    k = pl.program_id(1)

    @pl.when(k == 0)
    def _():
        acc_ref[...] = jnp.zeros_like(acc_ref)

    a = adj_ref[...]
    if mask_k:
        a = _mask_k_tail(a, k, tk, k_total)
    koff = pl.multiple_of(k * tk, tk)
    acc_ref[...] += jnp.dot(
        a, emb_ref[pl.ds(koff, tk), :],
        preferred_element_type=jnp.float32, precision=precision)

    @pl.when(k == pl.num_programs(1) - 1)
    def _():
        out_ref[...] = acc_ref[...].astype(out_ref.dtype)


def _gcn_streaming_kernel(adj_ref, emb_ref, out_ref, acc_ref, *, tk, k_total,
                          mask_k, precision):
    # Fallback for graphs where the embeds panel cannot stay resident in VMEM:
    # classic tiled matmul streaming (tk, tn) embeds blocks (embeds is
    # re-read once per M-tile, which is far cheaper than re-reading adj).
    k = pl.program_id(2)

    @pl.when(k == 0)
    def _():
        acc_ref[...] = jnp.zeros_like(acc_ref)

    a = adj_ref[...]
    if mask_k:
        a = _mask_k_tail(a, k, tk, k_total)
    acc_ref[...] += jnp.dot(
        a, emb_ref[...], preferred_element_type=jnp.float32,
        precision=precision)

    @pl.when(k == pl.num_programs(2) - 1)
    def _():
        out_ref[...] = acc_ref[...].astype(out_ref.dtype)


# ----------------------------------------------------------------------------
# Dispatchers
# ----------------------------------------------------------------------------
def _gcn_small(adj, embeds, out_dtype, precision):
    M, K = adj.shape
    _, D = embeds.shape
    _, limit = _vmem_budget_and_limit()
    return pl.pallas_call(
        functools.partial(_gcn_small_kernel, precision=precision),
        out_shape=jax.ShapeDtypeStruct((M, D), out_dtype),
        grid=(1,),
        in_specs=[pl.BlockSpec((M, K), lambda i: (0, 0)),
                  pl.BlockSpec((K, D), lambda i: (0, 0))],
        out_specs=pl.BlockSpec((M, D), lambda i: (0, 0)),
        compiler_params=pltpu.CompilerParams(vmem_limit_bytes=limit),
        cost_estimate=_cost_estimate(adj, embeds, out_dtype),
    )(adj, embeds)


def _gcn_tiled(adj, embeds, out_dtype, *, tm, tk, precision,
               use_pipeline_mode):
    M, K = adj.shape
    _, D = embeds.shape
    adj_b = adj.dtype.itemsize
    emb_b = embeds.dtype.itemsize
    out_b = jnp.dtype(out_dtype).itemsize
    acc_direct = jnp.dtype(out_dtype) == jnp.dtype(jnp.float32)
    budget, limit = _vmem_budget_and_limit()

    # Buffer counts: used both for the VMEM working-set model and the
    # pipeline_mode requests, kept consistent so we never under-budget.
    panel_bufs = 1 if use_pipeline_mode else 2  # panel block index is constant
    adj_bufs = 3 if use_pipeline_mode else 2    # deeper prefetch on the stream

    # Sublane multiple of the streaming dtype: 8 (f32) / 16 (bf16) / 32 (8-bit).
    sub = max(8, 32 // adj_b)
    dp = _round_up(D, 128)

    tm = _round_up(min(tm, M), sub)
    tk = _round_up(min(tk, K), 128)

    # v7x has 2 TensorCores: ensure the parallel M axis has >= 2 steps so both
    # get work (costs at most one extra ~0.35us step on single-core chips).
    if M > sub and pl.cdiv(M, tm) < 2:
        tm = _round_up(pl.cdiv(M, 2), sub)

    def resident_ws(tm_, tk_):
        kp_ = _round_up(K, tk_)
        return (panel_bufs * kp_ * dp * emb_b          # resident embeds panel
                + adj_bufs * tm_ * tk_ * adj_b         # streamed adj tiles
                + 2 * tm_ * dp * out_b                 # output block
                + (0 if acc_direct else tm_ * dp * 4)) # f32 accumulator

    # Keep the whole (padded) embeds resident so it is read from HBM once.
    # Shrink policy: never shrink the panel width (tn == dp); shrink tk, then
    # tm, then fall back to streaming.
    resident = True
    while resident and resident_ws(tm, tk) > budget:
        if tk > 512:
            tk = _round_down_to(tk // 2, 128)
        elif tm > 128:
            tm = _round_down_to(tm // 2, sub)
        else:
            resident = False

    tn = dp
    if not resident:
        def streaming_ws(tm_, tk_, tn_):
            return (adj_bufs * tm_ * tk_ * adj_b + 2 * tk_ * tn_ * emb_b
                    + 2 * tm_ * tn_ * out_b + tm_ * tn_ * 4)

        while streaming_ws(tm, tk, tn) > budget:
            if tk > 512:
                tk = _round_down_to(tk // 2, 128)
            elif tm > 128:
                tm = _round_down_to(tm // 2, sub)
            elif tn > 128:
                tn = _round_down_to(tn // 2, 128)
            elif tk > 128:
                tk = _round_down_to(tk // 2, 128)
            elif tm > sub:
                tm = _round_down_to(tm // 2, sub)
            else:
                break  # smallest legal tiles

    # Only embeds is padded (tiny); adj is consumed in place with cdiv grids.
    kp = _round_up(K, tk)
    emb_p = embeds
    if (kp, dp) != (K, D):
        emb_p = jnp.pad(embeds, ((0, kp - K), (0, dp - D)))

    mask_k = (K % tk) != 0
    grid_m = pl.cdiv(M, tm)
    grid_k = pl.cdiv(K, tk)

    def _spec(shape, index_map, bufs):
        if use_pipeline_mode:
            return pl.BlockSpec(shape, index_map,
                                pipeline_mode=pl.Buffered(bufs))
        return pl.BlockSpec(shape, index_map)

    if resident:
        grid = (grid_m, grid_k)
        adj_spec = _spec((tm, tk), lambda i, k: (i, k), adj_bufs)
        emb_spec = _spec((kp, dp), lambda i, k: (0, 0), panel_bufs)
        out_spec = pl.BlockSpec((tm, dp), lambda i, k: (i, 0))
        dims = ("parallel", "arbitrary")
        if acc_direct:
            kernel = functools.partial(_gcn_resident_accout_kernel, tk=tk,
                                       k_total=K, mask_k=mask_k,
                                       precision=precision)
            scratch = []
        else:
            kernel = functools.partial(_gcn_resident_scratch_kernel, tk=tk,
                                       k_total=K, mask_k=mask_k,
                                       precision=precision)
            scratch = [pltpu.VMEM((tm, dp), jnp.float32)]
    else:
        grid = (grid_m, pl.cdiv(dp, tn), grid_k)
        adj_spec = _spec((tm, tk), lambda i, j, k: (i, k), adj_bufs)
        emb_spec = pl.BlockSpec((tk, tn), lambda i, j, k: (k, j))
        out_spec = pl.BlockSpec((tm, tn), lambda i, j, k: (i, j))
        dims = ("parallel", "parallel", "arbitrary")
        kernel = functools.partial(_gcn_streaming_kernel, tk=tk, k_total=K,
                                   mask_k=mask_k, precision=precision)
        scratch = [pltpu.VMEM((tm, tn), jnp.float32)]

    out_p = pl.pallas_call(
        kernel,
        out_shape=jax.ShapeDtypeStruct((M, dp), out_dtype),
        grid_spec=pltpu.PrefetchScalarGridSpec(
            num_scalar_prefetch=0,
            grid=grid,
            in_specs=[adj_spec, emb_spec],
            out_specs=out_spec,
            scratch_shapes=scratch),
        compiler_params=pltpu.CompilerParams(
            dimension_semantics=dims,
            vmem_limit_bytes=limit),
        cost_estimate=_cost_estimate(adj, embeds, out_dtype),
    )(adj, emb_p)

    if dp != D:
        out_p = out_p[:, :D]
    return out_p


def gcn_layer(adj, embeds, *, tm=512, tk=2048, cast_to_bf16=False,
              precision=None, small_bytes=_SMALL_PROBLEM_BYTES):
    """Pallas TPU equivalent of GCNLayer.forward: adj.matmul(embeds).

    Notes:
      * The kernel is HBM-bound on `adj`.  For best throughput store `adj` in
        bf16 (v5e/v6e also int8; v7x fp8) *outside* this call and reuse it:
        at default MXU precision f32 operands are truncated to bf16 anyway,
        so f32-in-HBM pays full bandwidth without full-precision multiplies.
        `cast_to_bf16=True` casts here (one extra HBM round-trip) and keeps
        f32 accumulation.
      * For bit-exact f32 matmul semantics pass
        precision=jax.lax.Precision.HIGHEST (~3x MXU cost).
    """
    global _PIPELINE_MODE_OK
    M, K = adj.shape
    K2, D = embeds.shape
    assert K == K2, "adj inner dim must match embeds rows"
    out_dtype = jnp.result_type(adj.dtype, embeds.dtype)

    if cast_to_bf16:
        adj = adj.astype(jnp.bfloat16)
        embeds = embeds.astype(jnp.bfloat16)

    footprint = (adj.size * adj.dtype.itemsize
                 + embeds.size * embeds.dtype.itemsize
                 + M * D * jnp.dtype(out_dtype).itemsize)
    if footprint <= small_bytes:
        return _gcn_small(adj, embeds, out_dtype, precision)

    if _PIPELINE_MODE_OK:
        try:
            return _gcn_tiled(adj, embeds, out_dtype, tm=tm, tk=tk,
                              precision=precision, use_pipeline_mode=True)
        except Exception:
            # This jax build rejected BlockSpec pipeline_mode / pl.Buffered;
            # retry once with default double-buffering and a matching budget.
            _PIPELINE_MODE_OK = False
    return _gcn_tiled(adj, embeds, out_dtype, tm=tm, tk=tk,
                      precision=precision, use_pipeline_mode=False)


if __name__ == "__main__":
    key = jax.random.PRNGKey(0)
    k1, k2, k3, k4 = jax.random.split(key, 4)

    # Case 1: tiny graph (256 nodes, 128 features) -> single-step fast path.
    N, D = 256, 128
    adj = jax.random.uniform(k1, (N, N), dtype=jnp.float32)
    embeds = jax.random.normal(k2, (N, D), dtype=jnp.float32)
    out = jax.block_until_ready(gcn_layer(adj, embeds))
    ref = jnp.dot(adj, embeds, preferred_element_type=jnp.float32)
    assert out.shape == (N, D)
    assert jnp.allclose(out, ref, atol=1e-4, rtol=1e-4), "fast-path mismatch"

    # Case 2: tiled resident path with NON-divisible M/K tails: exercises the
    # pad-free adj handling, the in-kernel K-tail mask, multi-step k
    # accumulation and the Buffered pipeline hints.  Small tiles only to get a
    # multi-step grid at test scale; production defaults stay tm=512/tk=2048.
    M2, K2, D2 = 520, 392, 128
    adj2 = jax.random.uniform(k3, (M2, K2), dtype=jnp.float32)
    embeds2 = jax.random.normal(k4, (K2, D2), dtype=jnp.float32)
    out2 = jax.block_until_ready(
        gcn_layer(adj2, embeds2, tm=128, tk=128, small_bytes=0))
    ref2 = jnp.dot(adj2, embeds2, preferred_element_type=jnp.float32)
    assert out2.shape == (M2, D2)
    assert jnp.allclose(out2, ref2, atol=1e-2, rtol=1e-3), "tiled-path mismatch"

    print("KERNEL_OK")
</pallas_src>

<mosaic_0001>
module attributes {stable_mosaic.version = 11 : i64} {
  func.func @_gcn_small_kernel(%arg0: i32, %arg1: memref<256x256xf32, #tpu.memory_space<vmem>>, %arg2: memref<256x128xf32, #tpu.memory_space<vmem>>, %arg3: memref<256x128xf32, #tpu.memory_space<vmem>>) attributes {dimension_semantics = [#tpu.dimension_semantics<arbitrary>], iteration_bounds = array<i64: 1>, scalar_prefetch = 0 : i64, scratch_operands = 0 : i64, tpu.core_type = #tpu.core_type<tc>, window_params = [{pipeline_mode = #tpu.pipeline_mode<synchronous>, transform_indices = @transform_0, window_bounds = array<i64: 256, 256>}, {pipeline_mode = #tpu.pipeline_mode<synchronous>, transform_indices = @transform_1, window_bounds = array<i64: 256, 128>}, {pipeline_mode = #tpu.pipeline_mode<synchronous>, transform_indices = @transform_2, window_bounds = array<i64: 256, 128>}]} {
    %c0 = arith.constant 0 : index
    %c0_0 = arith.constant 0 : index
    %0 = vector.load %arg1[%c0, %c0_0] : memref<256x256xf32, #tpu.memory_space<vmem>>, vector<256x256xf32>
    %c0_1 = arith.constant 0 : index
    %c0_2 = arith.constant 0 : index
    %1 = vector.load %arg2[%c0_1, %c0_2] : memref<256x128xf32, #tpu.memory_space<vmem>>, vector<256x128xf32>
    %cst = arith.constant dense<0.000000e+00> : vector<256x128xf32>
    %2 = tpu.matmul %0, %1, %cst {dimension_numbers = #tpu.dot_dimension_numbers<[1], [0], [0], [1], [0, 0, 1, 1], [], []>} : vector<256x256xf32>, vector<256x128xf32>, vector<256x128xf32> -> vector<256x128xf32>
    %c0_3 = arith.constant 0 : index
    %c0_4 = arith.constant 0 : index
    %3 = vector.load %arg3[%c0_3, %c0_4] : memref<256x128xf32, #tpu.memory_space<vmem>>, vector<256x128xf32>
    tpu.vector_store %arg3[%c0_3, %c0_4], %2 {strides = array<i32>} : memref<256x128xf32, #tpu.memory_space<vmem>>, vector<256x128xf32>,
    return
  }
  func.func @transform_0(%arg0: i32) -> (i32, i32) {
    %c0_i32 = arith.constant 0 : i32
    %c0_i32_0 = arith.constant 0 : i32
    %c0_i32_1 = arith.constant 0 : i32
    return %c0_i32, %c0_i32_0 : i32, i32
  }
  func.func @transform_1(%arg0: i32) -> (i32, i32) {
    %c0_i32 = arith.constant 0 : i32
    %c0_i32_0 = arith.constant 0 : i32
    %c0_i32_1 = arith.constant 0 : i32
    return %c0_i32, %c0_i32_0 : i32, i32
  }
  func.func @transform_2(%arg0: i32) -> (i32, i32) {
    %c0_i32 = arith.constant 0 : i32
    %c0_i32_0 = arith.constant 0 : i32
    %c0_i32_1 = arith.constant 0 : i32
    return %c0_i32, %c0_i32_0 : i32, i32
  }
}

</mosaic_0001>

<bundles_post_ra>
// kernel: tpu_custom_call.1
= control target key start
LH: loop header
LB: loop body
LE: loop exit
PB: predicated region body
PF: predicated region fallthrough
CT: control target
= control target key end

     0   :  { %7 = vsyncpa [#allocation3], 0  ;;  %s651_s0 = inlined_call_operand.hbm [shape: f32[256,256], index: 0, kind: input, shape index: {}]   ;;  %s652_s1 = inlined_call_operand.hbm [shape: f32[256,128], index: 1, kind: input, shape index: {}]   ;;  %s653_s2 = inlined_call_operand.hbm [shape: f32[256,128], index: 2, kind: output, shape index: {}]  }
   0x1   :  { %8 = vsyncpa [#allocation6], 0 }
   0x2   :  { %9 = vsyncpa [#allocation4], 0  ;;  %s549_s9 = smov [#allocation2]  }
   0x3   :  { %s15_s10 = sshll.u32 %s549_s9, 4  ;;  %s16_s10 = int_to_ptr.vmem [resolvable:$true] %s15_s10 }
   0x4   :  { %s491_s11 = scalar_lea.vmem %s16_s10, 8192  ;;  %p496_p1 = scmp.lt.s32.totalorder %s16_s10, %s16_s10 }
   0x5   :  { %p492_p0 = scmp.ne.s32.totalorder %s16_s10, %s491_s11  ;;  %p497_p2 = scmp.lt.s32.totalorder %s491_s11, %s491_s11 }
   0x7   :  { %p498_p3 = por %p497_p2, %p496_p1 }
   0x9   :  { %p499_p4 = pnand %p498_p3, %p492_p0 }
   0xb   :  { %502 = shalt.err (!%p499_p4)
}
   0xc   :  { %s550_s12 = smov 256   ;;  %s551_s13 = smov 16  }
   0xd   :  { %21 = dma.hbm_to_vmem [thread:$0]  %s651_s0, 8192, %s16_s10, [#allocation3], %s550_s12, %s550_s12, %s551_s13  }
   0xe   :  { %s552_s16 = smov [#allocation5]  }
   0xf   :  { %s27_s17 = sshll.u32 %s552_s16, 4  ;;  %s28_s17 = int_to_ptr.vmem [resolvable:$true] %s27_s17 }
  0x10   :  { %s511_s18 = scalar_lea.vmem %s28_s17, 4096  ;;  %p516_p6 = scmp.lt.s32.totalorder %s28_s17, %s28_s17 }
  0x11   :  { %p512_p5 = scmp.ne.s32.totalorder %s28_s17, %s511_s18  ;;  %p517_p7 = scmp.lt.s32.totalorder %s511_s18, %s511_s18 }
  0x13   :  { %p518_p8 = por %p517_p7, %p516_p6 }
  0x15   :  { %p519_p9 = pnand %p518_p8, %p512_p5 }
  0x17   :  { %522 = shalt.err (!%p519_p9)
}
  0x18   :  { %s553_s19 = smov 128   ;;  %s554_s20 = smov 8  }
  0x19   :  { %33 = dma.hbm_to_vmem [thread:$0]  %s652_s1, 4096, %s28_s17, [#allocation6], %s553_s19, %s553_s19, %s554_s20  }
  0x1a   :  { %543 = dma.done.wait [#allocation3], 8192  }
  0x1b   :  { %544 = vsyncadd [#allocation3], 4294959104 }
  0x1c   :  { %545 = dma.done.wait [#allocation6], 4096  }
  0x1d   :  { %546 = vsyncadd [#allocation6], 4294963200  ;;  %v555_v0 = vmov 0.0   ;;  %v119_v1 = vld [vmem:[#allocation5 + $0x78] sm:$0xff]  ;;  %v118_v2 = vld [vmem:[#allocation5 + $0x70] sm:$0xff]  ;;  %s556_s0 = smov [#allocation7]  }
  0x1e   :  { %136 = vmatprep.subr.mxu0 %v555_v0  ;;  %411 = vmatprep.subr.mxu1 %v555_v0  ;;  %v117_v3 = vld [vmem:[#allocation5 + $0x68] sm:$0xff]  ;;  %v116_v4 = vld [vmem:[#allocation5 + $0x60] sm:$0xff]  ;;  %v115_v5 = vld [vmem:[#allocation5 + $0x58] sm:$0xff]  ;;  %s398_s1 = sshll.u32 %s556_s0, 4  ;;  %s399_s1 = int_to_ptr.vmem [resolvable:$true] %s398_s1 }
  0x1f   :  { %137 = vmatpush1.msra.mxu0 %v119_v1  ;;  %443 = vmatpush1.msra.mxu1 %v119_v1  ;;  %v114_v6 = vld [vmem:[#allocation5 + $0x50] sm:$0xff]  ;;  %v113_v7 = vld [vmem:[#allocation5 + $0x48] sm:$0xff]  ;;  %v112_v8 = vld [vmem:[#allocation5 + $0x40] sm:$0xff]  ;;  %s523_s23 = scalar_lea.vmem %s399_s1, 4096  ;;  %p528_p11 = scmp.lt.s32.totalorder %s399_s1, %s399_s1 }
  0x20   :  { %138 = vmatprep.subr.mxu0 %v555_v0  ;;  %412 = vmatprep.subr.mxu1 %v555_v0  ;;  %v111_v9 = vld [vmem:[#allocation5 + $0x38] sm:$0xff]  ;;  %v110_v10 = vld [vmem:[#allocation5 + $0x30] sm:$0xff]  ;;  %v109_v11 = vld [vmem:[#allocation5 + $0x28] sm:$0xff]  ;;  %p524_p10 = scmp.ne.s32.totalorder %s399_s1, %s523_s23  ;;  %p529_p12 = scmp.lt.s32.totalorder %s523_s23, %s523_s23 }
  0x21   :  { %139 = vmatpush1.msra.mxu0 %v118_v2  ;;  %444 = vmatpush1.msra.mxu1 %v118_v2  ;;  %v108_v12 = vld [vmem:[#allocation5 + $0x20] sm:$0xff]  ;;  %v107_v13 = vld [vmem:[#allocation5 + $0x18] sm:$0xff]  ;;  %v106_v14 = vld [vmem:[#allocation5 + $0x10] sm:$0xff] }
  0x22   :  { %140 = vmatprep.subr.mxu0 %v555_v0  ;;  %413 = vmatprep.subr.mxu1 %v555_v0  ;;  %v105_v15 = vld [vmem:[#allocation5 + $0x8] sm:$0xff]  ;;  %v104_v16 = vld [vmem:[#allocation5] sm:$0xff]  ;;  %v135_v17 = vld [vmem:[#allocation5 + $0xf8] sm:$0xff]  ;;  %p530_p13 = por %p529_p12, %p528_p11 }
  0x23   :  { %141 = vmatpush1.msra.mxu0 %v117_v3  ;;  %445 = vmatpush1.msra.mxu1 %v117_v3  ;;  %v134_v18 = vld [vmem:[#allocation5 + $0xf0] sm:$0xff]  ;;  %v133_v19 = vld [vmem:[#allocation5 + $0xe8] sm:$0xff]  ;;  %v132_v20 = vld [vmem:[#allocation5 + $0xe0] sm:$0xff] }
  0x24   :  { %142 = vmatprep.subr.mxu0 %v555_v0  ;;  %414 = vmatprep.subr.mxu1 %v555_v0  ;;  %v131_v21 = vld [vmem:[#allocation5 + $0xd8] sm:$0xff]  ;;  %v130_v22 = vld [vmem:[#allocation5 + $0xd0] sm:$0xff]  ;;  %v129_v23 = vld [vmem:[#allocation5 + $0xc8] sm:$0xff]  ;;  %p531_p0 = pnand %p530_p13, %p524_p10 }
  0x25   :  { %143 = vmatpush1.msra.mxu0 %v116_v4  ;;  %446 = vmatpush1.msra.mxu1 %v116_v4  ;;  %v128_v24 = vld [vmem:[#allocation5 + $0xc0] sm:$0xff]  ;;  %v127_v25 = vld [vmem:[#allocation5 + $0xb8] sm:$0xff]  ;;  %v126_v26 = vld [vmem:[#allocation5 + $0xb0] sm:$0xff] }
  0x26   :  { %144 = vmatprep.subr.mxu0 %v555_v0  ;;  %415 = vmatprep.subr.mxu1 %v555_v0  ;;  %v125_v27 = vld [vmem:[#allocation5 + $0xa8] sm:$0xff]  ;;  %v124_v28 = vld [vmem:[#allocation5 + $0xa0] sm:$0xff]  ;;  %v123_v29 = vld [vmem:[#allocation5 + $0x98] sm:$0xff] }
  0x27   :  { %145 = vmatpush1.msra.mxu0 %v115_v5  ;;  %447 = vmatpush1.msra.mxu1 %v115_v5  ;;  %v122_v30 = vld [vmem:[#allocation5 + $0x90] sm:$0xff]  ;;  %v121_v31 = vld [vmem:[#allocation5 + $0x88] sm:$0xff]  ;;  %v120_v32 = vld [vmem:[#allocation5 + $0x80] sm:$0xff] }
  0x28   :  { %146 = vmatprep.subr.mxu0 %v555_v0  ;;  %416 = vmatprep.subr.mxu1 %v555_v0  ;;  %v41_v33 = vld [vmem:[#allocation2 + $0x8] sm:$0xff]  ;;  %v40_v35 = vld [vmem:[#allocation2] sm:$0xff]  ;;  %v43_v37 = vld [vmem:[#allocation2 + $0x18] sm:$0xff] }
  0x29   :  { %147 = vmatpush1.msra.mxu0 %v114_v6  ;;  %448 = vmatpush1.msra.mxu1 %v114_v6  ;;  %v73_v34 = vld [vmem:[#allocation2 + $0x108] sm:$0xff]  ;;  %v72_v36 = vld [vmem:[#allocation2 + $0x100] sm:$0xff]  ;;  %v75_v38 = vld [vmem:[#allocation2 + $0x118] sm:$0xff] }
  0x2a   :  { %148 = vmatprep.subr.mxu0 %v555_v0  ;;  %417 = vmatprep.subr.mxu1 %v555_v0  ;;  %v42_v39 = vld [vmem:[#allocation2 + $0x10] sm:$0xff]  ;;  %v45_v41 = vld [vmem:[#allocation2 + $0x28] sm:$0xff]  ;;  %v44_v43 = vld [vmem:[#allocation2 + $0x20] sm:$0xff] }
  0x2b   :  { %149 = vmatpush1.msra.mxu0 %v113_v7  ;;  %449 = vmatpush1.msra.mxu1 %v113_v7  ;;  %v74_v40 = vld [vmem:[#allocation2 + $0x110] sm:$0xff]  ;;  %v77_v42 = vld [vmem:[#allocation2 + $0x128] sm:$0xff]  ;;  %v76_v44 = vld [vmem:[#allocation2 + $0x120] sm:$0xff] }
  0x2c   :  { %150 = vmatprep.subr.mxu0 %v555_v0  ;;  %418 = vmatprep.subr.mxu1 %v555_v0  ;;  %v47_v45 = vld [vmem:[#allocation2 + $0x38] sm:$0xff]  ;;  %v46_v47 = vld [vmem:[#allocation2 + $0x30] sm:$0xff]  ;;  %v49_v49 = vld [vmem:[#allocation2 + $0x48] sm:$0xff] }
  0x2d   :  { %151 = vmatpush1.msra.mxu0 %v112_v8  ;;  %450 = vmatpush1.msra.mxu1 %v112_v8  ;;  %v79_v46 = vld [vmem:[#allocation2 + $0x138] sm:$0xff]  ;;  %v78_v48 = vld [vmem:[#allocation2 + $0x130] sm:$0xff]  ;;  %v81_v50 = vld [vmem:[#allocation2 + $0x148] sm:$0xff] }
  0x2e   :  { %152 = vmatprep.subr.mxu0 %v555_v0  ;;  %419 = vmatprep.subr.mxu1 %v555_v0  ;;  %v48_v51 = vld [vmem:[#allocation2 + $0x40] sm:$0xff]  ;;  %v51_v53 = vld [vmem:[#allocation2 + $0x58] sm:$0xff]  ;;  %v50_v55 = vld [vmem:[#allocation2 + $0x50] sm:$0xff] }
  0x2f   :  { %153 = vmatpush1.msra.mxu0 %v111_v9  ;;  %451 = vmatpush1.msra.mxu1 %v111_v9  ;;  %v80_v52 = vld [vmem:[#allocation2 + $0x140] sm:$0xff]  ;;  %v83_v54 = vld [vmem:[#allocation2 + $0x158] sm:$0xff]  ;;  %v82_v56 = vld [vmem:[#allocation2 + $0x150] sm:$0xff] }
  0x30   :  { %154 = vmatprep.subr.mxu0 %v555_v0  ;;  %420 = vmatprep.subr.mxu1 %v555_v0  ;;  %v53_v57 = vld [vmem:[#allocation2 + $0x68] sm:$0xff]  ;;  %v52_v59 = vld [vmem:[#allocation2 + $0x60] sm:$0xff]  ;;  %v55_v61 = vld [vmem:[#allocation2 + $0x78] sm:$0xff] }
  0x31   :  { %155 = vmatpush1.msra.mxu0 %v110_v10  ;;  %452 = vmatpush1.msra.mxu1 %v110_v10  ;;  %v85_v58 = vld [vmem:[#allocation2 + $0x168] sm:$0xff]  ;;  %v84_v60 = vld [vmem:[#allocation2 + $0x160] sm:$0xff]  ;;  %v87_v62 = vld [vmem:[#allocation2 + $0x178] sm:$0xff] }
  0x32   :  { %156 = vmatprep.subr.mxu0 %v555_v0  ;;  %421 = vmatprep.subr.mxu1 %v555_v0  ;;  %v54_v63 = vld [vmem:[#allocation2 + $0x70] sm:$0xff]  ;;  %v57_v1 = vld [vmem:[#allocation2 + $0x88] sm:$0xff]  ;;  %v56_v3 = vld [vmem:[#allocation2 + $0x80] sm:$0xff] }
  0x33   :  { %157 = vmatpush1.msra.mxu0 %v109_v11  ;;  %453 = vmatpush1.msra.mxu1 %v109_v11  ;;  %v89_v2 = vld [vmem:[#allocation2 + $0x188] sm:$0xff]  ;;  %v88_v4 = vld [vmem:[#allocation2 + $0x180] sm:$0xff]  ;;  %v59_v5 = vld [vmem:[#allocation2 + $0x98] sm:$0xff] }
  0x34   :  { %158 = vmatprep.subr.mxu0 %v555_v0  ;;  %422 = vmatprep.subr.mxu1 %v555_v0  ;;  %v91_v6 = vld [vmem:[#allocation2 + $0x198] sm:$0xff]  ;;  %v58_v7 = vld [vmem:[#allocation2 + $0x90] sm:$0xff]  ;;  %v61_v9 = vld [vmem:[#allocation2 + $0xa8] sm:$0xff] }
  0x35   :  { %159 = vmatpush1.msra.mxu0 %v108_v12  ;;  %454 = vmatpush1.msra.mxu1 %v108_v12  ;;  %v90_v8 = vld [vmem:[#allocation2 + $0x190] sm:$0xff]  ;;  %v93_v10 = vld [vmem:[#allocation2 + $0x1a8] sm:$0xff]  ;;  %v60_v11 = vld [vmem:[#allocation2 + $0xa0] sm:$0xff] }
  0x36   :  { %160 = vmatprep.subr.mxu0 %v555_v0  ;;  %423 = vmatprep.subr.mxu1 %v555_v0  ;;  %v92_v12 = vld [vmem:[#allocation2 + $0x1a0] sm:$0xff] }
  0x37   :  { %161 = vmatpush1.msra.mxu0 %v107_v13  ;;  %455 = vmatpush1.msra.mxu1 %v107_v13  ;;  %v63_v13 = vld [vmem:[#allocation2 + $0xb8] sm:$0xff] }
  0x38   :  { %162 = vmatprep.subr.mxu0 %v555_v0  ;;  %424 = vmatprep.subr.mxu1 %v555_v0 }
  0x39   :  { %163 = vmatpush1.msra.mxu0 %v106_v14  ;;  %456 = vmatpush1.msra.mxu1 %v106_v14  ;;  %v95_v14 = vld [vmem:[#allocation2 + $0x1b8] sm:$0xff] }
  0x3a   :  { %164 = vmatprep.subr.mxu0 %v555_v0  ;;  %425 = vmatprep.subr.mxu1 %v555_v0 }
  0x3b   :  { %165 = vmatpush1.msra.mxu0 %v105_v15  ;;  %457 = vmatpush1.msra.mxu1 %v105_v15  ;;  %v62_v15 = vld [vmem:[#allocation2 + $0xb0] sm:$0xff] }
  0x3c   :  { %166 = vmatprep.subr.mxu0 %v555_v0  ;;  %426 = vmatprep.subr.mxu1 %v555_v0 }
  0x3d   :  { %167 = vmatpush1.msra.mxu0 %v104_v16  ;;  %458 = vmatpush1.msra.mxu1 %v104_v16  ;;  %v94_v16 = vld [vmem:[#allocation2 + $0x1b0] sm:$0xff] }
  0x3e   :  { %168 = vmatprep.subr.mxu0 %v555_v0  ;;  %427 = vmatprep.subr.mxu1 %v555_v0 }
  0x3f   :  { %169 = vmatpush2.msra.mxu0 %v135_v17  ;;  %459 = vmatpush2.msra.mxu1 %v135_v17  ;;  %v65_v17 = vld [vmem:[#allocation2 + $0xc8] sm:$0xff] }
  0x40   :  { %170 = vmatprep.subr.mxu0 %v555_v0  ;;  %428 = vmatprep.subr.mxu1 %v555_v0 }
  0x41   :  { %171 = vmatpush2.msra.mxu0 %v134_v18  ;;  %460 = vmatpush2.msra.mxu1 %v134_v18  ;;  %v97_v18 = vld [vmem:[#allocation2 + $0x1c8] sm:$0xff] }
  0x42   :  { %172 = vmatprep.subr.mxu0 %v555_v0  ;;  %429 = vmatprep.subr.mxu1 %v555_v0 }
  0x43   :  { %173 = vmatpush2.msra.mxu0 %v133_v19  ;;  %461 = vmatpush2.msra.mxu1 %v133_v19  ;;  %v64_v19 = vld [vmem:[#allocation2 + $0xc0] sm:$0xff] }
  0x44   :  { %174 = vmatprep.subr.mxu0 %v555_v0  ;;  %430 = vmatprep.subr.mxu1 %v555_v0 }
  0x45   :  { %175 = vmatpush2.msra.mxu0 %v132_v20  ;;  %462 = vmatpush2.msra.mxu1 %v132_v20  ;;  %v96_v20 = vld [vmem:[#allocation2 + $0x1c0] sm:$0xff] }
  0x46   :  { %176 = vmatprep.subr.mxu0 %v555_v0  ;;  %431 = vmatprep.subr.mxu1 %v555_v0 }
  0x47   :  { %177 = vmatpush2.msra.mxu0 %v131_v21  ;;  %463 = vmatpush2.msra.mxu1 %v131_v21  ;;  %v67_v21 = vld [vmem:[#allocation2 + $0xd8] sm:$0xff] }
  0x48   :  { %178 = vmatprep.subr.mxu0 %v555_v0  ;;  %432 = vmatprep.subr.mxu1 %v555_v0 }
  0x49   :  { %179 = vmatpush2.msra.mxu0 %v130_v22  ;;  %464 = vmatpush2.msra.mxu1 %v130_v22  ;;  %v99_v22 = vld [vmem:[#allocation2 + $0x1d8] sm:$0xff] }
  0x4a   :  { %180 = vmatprep.subr.mxu0 %v555_v0  ;;  %433 = vmatprep.subr.mxu1 %v555_v0 }
  0x4b   :  { %181 = vmatpush2.msra.mxu0 %v129_v23  ;;  %465 = vmatpush2.msra.mxu1 %v129_v23  ;;  %v66_v23 = vld [vmem:[#allocation2 + $0xd0] sm:$0xff] }
  0x4c   :  { %182 = vmatprep.subr.mxu0 %v555_v0  ;;  %434 = vmatprep.subr.mxu1 %v555_v0 }
  0x4d   :  { %183 = vmatpush2.msra.mxu0 %v128_v24  ;;  %466 = vmatpush2.msra.mxu1 %v128_v24  ;;  %v98_v24 = vld [vmem:[#allocation2 + $0x1d0] sm:$0xff] }
  0x4e   :  { %184 = vmatprep.subr.mxu0 %v555_v0  ;;  %435 = vmatprep.subr.mxu1 %v555_v0 }
  0x4f   :  { %185 = vmatpush2.msra.mxu0 %v127_v25  ;;  %467 = vmatpush2.msra.mxu1 %v127_v25  ;;  %v69_v25 = vld [vmem:[#allocation2 + $0xe8] sm:$0xff] }
  0x50   :  { %186 = vmatprep.subr.mxu0 %v555_v0  ;;  %436 = vmatprep.subr.mxu1 %v555_v0 }
  0x51   :  { %187 = vmatpush2.msra.mxu0 %v126_v26  ;;  %468 = vmatpush2.msra.mxu1 %v126_v26  ;;  %v101_v26 = vld [vmem:[#allocation2 + $0x1e8] sm:$0xff] }
  0x52   :  { %188 = vmatprep.subr.mxu0 %v555_v0  ;;  %437 = vmatprep.subr.mxu1 %v555_v0 }
  0x53   :  { %189 = vmatpush2.msra.mxu0 %v125_v27  ;;  %469 = vmatpush2.msra.mxu1 %v125_v27  ;;  %v68_v27 = vld [vmem:[#allocation2 + $0xe0] sm:$0xff] }
  0x54   :  { %190 = vmatprep.subr.mxu0 %v555_v0  ;;  %438 = vmatprep.subr.mxu1 %v555_v0 }
  0x55   :  { %191 = vmatpush2.msra.mxu0 %v124_v28  ;;  %470 = vmatpush2.msra.mxu1 %v124_v28  ;;  %v100_v28 = vld [vmem:[#allocation2 + $0x1e0] sm:$0xff] }
  0x56   :  { %192 = vmatprep.subr.mxu0 %v555_v0  ;;  %439 = vmatprep.subr.mxu1 %v555_v0 }
  0x57   :  { %193 = vmatpush2.msra.mxu0 %v123_v29  ;;  %471 = vmatpush2.msra.mxu1 %v123_v29  ;;  %v71_v29 = vld [vmem:[#allocation2 + $0xf8] sm:$0xff] }
  0x58   :  { %194 = vmatprep.subr.mxu0 %v555_v0  ;;  %440 = vmatprep.subr.mxu1 %v555_v0 }
  0x59   :  { %195 = vmatpush2.msra.mxu0 %v122_v30  ;;  %472 = vmatpush2.msra.mxu1 %v122_v30  ;;  %v103_v30 = vld [vmem:[#allocation2 + $0x1f8] sm:$0xff] }
  0x5a   :  { %196 = vmatprep.subr.mxu0 %v555_v0  ;;  %441 = vmatprep.subr.mxu1 %v555_v0 }
  0x5b   :  { %197 = vmatpush2.msra.mxu0 %v121_v31  ;;  %473 = vmatpush2.msra.mxu1 %v121_v31  ;;  %v70_v31 = vld [vmem:[#allocation2 + $0xf0] sm:$0xff] }
  0x5c   :  { %198 = vmatprep.subr.mxu0 %v555_v0  ;;  %442 = vmatprep.subr.mxu1 %v555_v0  ;;  %v86_v0 = vld [vmem:[#allocation2 + $0x170] sm:$0xff] }
  0x5d   :  { %199 = vmatpush2.msra.mxu0 %v120_v32  ;;  %474 = vmatpush2.msra.mxu1 %v120_v32  ;;  %v102_v32 = vld [vmem:[#allocation2 + $0x1f0] sm:$0xff] }
  0x5e   :  { %200 = vmatprep.mubr.f32.mxu0 %v41_v33  ;;  %280 = vmatprep.mubr.f32.mxu1 %v73_v34 }
  0x5f   :  { %201 = vmatmul.mubr.f32.vlgmr.msra.gmra.mxu0 %v40_v35  ;;  %281 = vmatmul.mubr.f32.vlgmr.msra.gmra.mxu1 %v72_v36 }
  0x60   :  { %205 = vmatprep.mubr.f32.mxu0 %v43_v37  ;;  %285 = vmatprep.mubr.f32.mxu1 %v75_v38 }
  0x63   :  { %206 = vmatmul.mubr.f32.gmra.mxu0 %v42_v39  ;;  %286 = vmatmul.mubr.f32.gmra.mxu1 %v74_v40 }
  0x64   :  { %210 = vmatprep.mubr.f32.mxu0 %v45_v41  ;;  %290 = vmatprep.mubr.f32.mxu1 %v77_v42 }
  0x67   :  { %211 = vmatmul.mubr.f32.gmra.mxu0 %v44_v43  ;;  %291 = vmatmul.mubr.f32.gmra.mxu1 %v76_v44 }
  0x68   :  { %215 = vmatprep.mubr.f32.mxu0 %v47_v45  ;;  %295 = vmatprep.mubr.f32.mxu1 %v79_v46 }
  0x6b   :  { %216 = vmatmul.mubr.f32.gmra.mxu0 %v46_v47  ;;  %296 = vmatmul.mubr.f32.gmra.mxu1 %v78_v48 }
  0x6c   :  { %220 = vmatprep.mubr.f32.mxu0 %v49_v49  ;;  %300 = vmatprep.mubr.f32.mxu1 %v81_v50 }
  0x6f   :  { %221 = vmatmul.mubr.f32.gmra.mxu0 %v48_v51  ;;  %301 = vmatmul.mubr.f32.gmra.mxu1 %v80_v52 }
  0x70   :  { %225 = vmatprep.mubr.f32.mxu0 %v51_v53  ;;  %305 = vmatprep.mubr.f32.mxu1 %v83_v54 }
  0x73   :  { %226 = vmatmul.mubr.f32.gmra.mxu0 %v50_v55  ;;  %306 = vmatmul.mubr.f32.gmra.mxu1 %v82_v56 }
  0x74   :  { %230 = vmatprep.mubr.f32.mxu0 %v53_v57  ;;  %310 = vmatprep.mubr.f32.mxu1 %v85_v58 }
  0x77   :  { %231 = vmatmul.mubr.f32.gmra.mxu0 %v52_v59  ;;  %311 = vmatmul.mubr.f32.gmra.mxu1 %v84_v60 }
  0x78   :  { %235 = vmatprep.mubr.f32.mxu0 %v55_v61  ;;  %315 = vmatprep.mubr.f32.mxu1 %v87_v62 }
  0x7b   :  { %236 = vmatmul.mubr.f32.gmra.mxu0 %v54_v63  ;;  %316 = vmatmul.mubr.f32.gmra.mxu1 %v86_v0 }
  0x7c   :  { %240 = vmatprep.mubr.f32.mxu0 %v57_v1  ;;  %320 = vmatprep.mubr.f32.mxu1 %v89_v2 }
  0x7f   :  { %241 = vmatmul.mubr.f32.gmra.mxu0 %v56_v3  ;;  %321 = vmatmul.mubr.f32.gmra.mxu1 %v88_v4 }
  0x80   :  { %245 = vmatprep.mubr.f32.mxu0 %v59_v5  ;;  %325 = vmatprep.mubr.f32.mxu1 %v91_v6 }
  0x83   :  { %246 = vmatmul.mubr.f32.gmra.mxu0 %v58_v7  ;;  %326 = vmatmul.mubr.f32.gmra.mxu1 %v90_v8 }
  0x84   :  { %250 = vmatprep.mubr.f32.mxu0 %v61_v9  ;;  %330 = vmatprep.mubr.f32.mxu1 %v93_v10 }
  0x87   :  { %251 = vmatmul.mubr.f32.gmra.mxu0 %v60_v11  ;;  %331 = vmatmul.mubr.f32.gmra.mxu1 %v92_v12 }
  0x88   :  { %255 = vmatprep.mubr.f32.mxu0 %v63_v13  ;;  %335 = vmatprep.mubr.f32.mxu1 %v95_v14 }
  0x8b   :  { %256 = vmatmul.mubr.f32.gmra.mxu0 %v62_v15  ;;  %336 = vmatmul.mubr.f32.gmra.mxu1 %v94_v16 }
  0x8c   :  { %260 = vmatprep.mubr.f32.mxu0 %v65_v17  ;;  %340 = vmatprep.mubr.f32.mxu1 %v97_v18 }
  0x8f   :  { %261 = vmatmul.mubr.f32.gmra.mxu0 %v64_v19  ;;  %341 = vmatmul.mubr.f32.gmra.mxu1 %v96_v20 }
  0x90   :  { %265 = vmatprep.mubr.f32.mxu0 %v67_v21  ;;  %345 = vmatprep.mubr.f32.mxu1 %v99_v22 }
  0x93   :  { %266 = vmatmul.mubr.f32.gmra.mxu0 %v66_v23  ;;  %346 = vmatmul.mubr.f32.gmra.mxu1 %v98_v24 }
  0x94   :  { %270 = vmatprep.mubr.f32.mxu0 %v69_v25  ;;  %350 = vmatprep.mubr.f32.mxu1 %v101_v26 }
  0x97   :  { %271 = vmatmul.mubr.f32.gmra.mxu0 %v68_v27  ;;  %351 = vmatmul.mubr.f32.gmra.mxu1 %v100_v28 }
  0x98   :  { %275 = vmatprep.mubr.f32.mxu0 %v71_v29  ;;  %355 = vmatprep.mubr.f32.mxu1 %v103_v30 }
  0x9b   :  { %276 = vmatmul.mubr.f32.gmra.mxu0 %v70_v31  ;;  %356 = vmatmul.mubr.f32.gmra.mxu1 %v102_v32 }
 0x11f   :  { %v202_v33 = vpop.f32.mrf.mxu0  ;;  %v282_v34 = vpop.f32.mrf.mxu1 }
 0x120   :  { %361 = vst [vmem:[#allocation7] sm:$0xff] %v202_v33  ;;  %377 = vst [vmem:[#allocation7 + $0x80] sm:$0xff] %v282_v34 }
 0x121   :  { %v204_v35 = vpop.f32.mrf.mxu0  ;;  %v284_v36 = vpop.f32.mrf.mxu1 }
 0x123   :  { %v207_v37 = vpop.f32.mrf.mxu0  ;;  %v287_v38 = vpop.f32.mrf.mxu1 }
 0x124   :  { %362 = vst [vmem:[#allocation7 + $0x8] sm:$0xff] %v207_v37  ;;  %378 = vst [vmem:[#allocation7 + $0x88] sm:$0xff] %v287_v38 }
 0x125   :  { %v209_v39 = vpop.f32.mrf.mxu0  ;;  %v289_v40 = vpop.f32.mrf.mxu1 }
 0x127   :  { %v212_v41 = vpop.f32.mrf.mxu0  ;;  %v292_v42 = vpop.f32.mrf.mxu1 }
 0x128   :  { %363 = vst [vmem:[#allocation7 + $0x10] sm:$0xff] %v212_v41  ;;  %379 = vst [vmem:[#allocation7 + $0x90] sm:$0xff] %v292_v42 }
 0x129   :  { %v214_v43 = vpop.f32.mrf.mxu0  ;;  %v294_v44 = vpop.f32.mrf.mxu1 }
 0x12b   :  { %v217_v45 = vpop.f32.mrf.mxu0  ;;  %v297_v46 = vpop.f32.mrf.mxu1 }
 0x12c   :  { %364 = vst [vmem:[#allocation7 + $0x18] sm:$0xff] %v217_v45  ;;  %380 = vst [vmem:[#allocation7 + $0x98] sm:$0xff] %v297_v46 }
 0x12d   :  { %v219_v47 = vpop.f32.mrf.mxu0  ;;  %v299_v48 = vpop.f32.mrf.mxu1 }
 0x12f   :  { %v222_v49 = vpop.f32.mrf.mxu0  ;;  %v302_v50 = vpop.f32.mrf.mxu1 }
 0x130   :  { %365 = vst [vmem:[#allocation7 + $0x20] sm:$0xff] %v222_v49  ;;  %381 = vst [vmem:[#allocation7 + $0xa0] sm:$0xff] %v302_v50 }
 0x131   :  { %v224_v51 = vpop.f32.mrf.mxu0  ;;  %v304_v52 = vpop.f32.mrf.mxu1 }
 0x133   :  { %v227_v53 = vpop.f32.mrf.mxu0  ;;  %v307_v54 = vpop.f32.mrf.mxu1 }
 0x134   :  { %366 = vst [vmem:[#allocation7 + $0x28] sm:$0xff] %v227_v53  ;;  %382 = vst [vmem:[#allocation7 + $0xa8] sm:$0xff] %v307_v54 }
 0x135   :  { %v229_v55 = vpop.f32.mrf.mxu0  ;;  %v309_v56 = vpop.f32.mrf.mxu1 }
 0x137   :  { %v232_v57 = vpop.f32.mrf.mxu0  ;;  %v312_v58 = vpop.f32.mrf.mxu1 }
 0x138   :  { %367 = vst [vmem:[#allocation7 + $0x30] sm:$0xff] %v232_v57  ;;  %383 = vst [vmem:[#allocation7 + $0xb0] sm:$0xff] %v312_v58 }
 0x139   :  { %v234_v59 = vpop.f32.mrf.mxu0  ;;  %v314_v60 = vpop.f32.mrf.mxu1 }
 0x13b   :  { %v237_v61 = vpop.f32.mrf.mxu0  ;;  %v317_v62 = vpop.f32.mrf.mxu1 }
 0x13c   :  { %368 = vst [vmem:[#allocation7 + $0x38] sm:$0xff] %v237_v61  ;;  %384 = vst [vmem:[#allocation7 + $0xb8] sm:$0xff] %v317_v62 }
 0x13d   :  { %v239_v63 = vpop.f32.mrf.mxu0  ;;  %v319_v0 = vpop.f32.mrf.mxu1 }
 0x13f   :  { %v242_v1 = vpop.f32.mrf.mxu0  ;;  %v322_v2 = vpop.f32.mrf.mxu1 }
 0x140   :  { %369 = vst [vmem:[#allocation7 + $0x40] sm:$0xff] %v242_v1  ;;  %385 = vst [vmem:[#allocation7 + $0xc0] sm:$0xff] %v322_v2 }
 0x141   :  { %v244_v3 = vpop.f32.mrf.mxu0  ;;  %v324_v4 = vpop.f32.mrf.mxu1 }
 0x143   :  { %v247_v5 = vpop.f32.mrf.mxu0  ;;  %v327_v6 = vpop.f32.mrf.mxu1 }
 0x144   :  { %370 = vst [vmem:[#allocation7 + $0x48] sm:$0xff] %v247_v5  ;;  %386 = vst [vmem:[#allocation7 + $0xc8] sm:$0xff] %v327_v6 }
 0x145   :  { %v249_v7 = vpop.f32.mrf.mxu0  ;;  %v329_v8 = vpop.f32.mrf.mxu1 }
 0x147   :  { %v252_v9 = vpop.f32.mrf.mxu0  ;;  %v332_v10 = vpop.f32.mrf.mxu1 }
 0x148   :  { %371 = vst [vmem:[#allocation7 + $0x50] sm:$0xff] %v252_v9  ;;  %387 = vst [vmem:[#allocation7 + $0xd0] sm:$0xff] %v332_v10 }
 0x149   :  { %v254_v11 = vpop.f32.mrf.mxu0  ;;  %v334_v12 = vpop.f32.mrf.mxu1 }
 0x14b   :  { %v257_v13 = vpop.f32.mrf.mxu0  ;;  %v337_v14 = vpop.f32.mrf.mxu1 }
 0x14c   :  { %372 = vst [vmem:[#allocation7 + $0x58] sm:$0xff] %v257_v13  ;;  %388 = vst [vmem:[#allocation7 + $0xd8] sm:$0xff] %v337_v14 }
 0x14d   :  { %v259_v15 = vpop.f32.mrf.mxu0  ;;  %v339_v16 = vpop.f32.mrf.mxu1 }
 0x14f   :  { %v262_v17 = vpop.f32.mrf.mxu0  ;;  %v342_v18 = vpop.f32.mrf.mxu1 }
 0x150   :  { %373 = vst [vmem:[#allocation7 + $0x60] sm:$0xff] %v262_v17  ;;  %389 = vst [vmem:[#allocation7 + $0xe0] sm:$0xff] %v342_v18 }
 0x151   :  { %v264_v19 = vpop.f32.mrf.mxu0  ;;  %v344_v20 = vpop.f32.mrf.mxu1 }
 0x153   :  { %v267_v21 = vpop.f32.mrf.mxu0  ;;  %v347_v22 = vpop.f32.mrf.mxu1 }
 0x154   :  { %374 = vst [vmem:[#allocation7 + $0x68] sm:$0xff] %v267_v21  ;;  %390 = vst [vmem:[#allocation7 + $0xe8] sm:$0xff] %v347_v22 }
 0x155   :  { %v269_v23 = vpop.f32.mrf.mxu0  ;;  %v349_v24 = vpop.f32.mrf.mxu1 }
 0x157   :  { %v272_v25 = vpop.f32.mrf.mxu0  ;;  %v352_v26 = vpop.f32.mrf.mxu1 }
 0x158   :  { %375 = vst [vmem:[#allocation7 + $0x70] sm:$0xff] %v272_v25  ;;  %391 = vst [vmem:[#allocation7 + $0xf0] sm:$0xff] %v352_v26 }
 0x159   :  { %v274_v27 = vpop.f32.mrf.mxu0  ;;  %v354_v28 = vpop.f32.mrf.mxu1 }
 0x15b   :  { %v277_v29 = vpop.f32.mrf.mxu0  ;;  %v357_v30 = vpop.f32.mrf.mxu1 }
 0x15c   :  { %376 = vst [vmem:[#allocation7 + $0x78] sm:$0xff] %v277_v29  ;;  %392 = vst [vmem:[#allocation7 + $0xf8] sm:$0xff] %v357_v30 }
 0x15d   :  { %v279_v31 = vpop.f32.mrf.mxu0  ;;  %v359_v32 = vpop.f32.mrf.mxu1 }
 0x15e   :  { %534 = shalt.err (!%p531_p0)
}
 0x15f   :  { %404 = dma.vmem_to_hbm [thread:$0]  %s399_s1, 4096, %s653_s2, [#allocation4], %s553_s19, %s553_s19, %s554_s20  }
 0x160   :  { %547 = dma.done.wait [#allocation4], 4096  }
 0x161   :  { %548 = vsyncadd [#allocation4], 4294963200 }
 0x162   :  { %408 = vsyncpa [#allocation3], 1 }
 0x163   :  { %409 = vsyncpa [#allocation6], 1 }
 0x164   :  { %410 = vsyncpa [#allocation4], 1 }

</bundles_post_ra>
